<compile_context>
chip_gen: v5e
topology: v5e:2x2
jax: 0.10.0
libtpu: 0.0.40
codegen_flags: <defaults>
</compile_context>

<pallas_src>
import jax
import jax.numpy as jnp
from jax.experimental import pallas as pl
from jax.experimental.pallas import tpu as pltpu

# Module hyper-parameters implied by the PyTorch code
MAX_LENGTH = 8      # max_length (fc1 input dim)
HIDDEN_DIM = 6      # hidden_dim
OUTPUT_DIM = 2      # output_dim
BATCH = 2

_SMALL_BATCH_CUTOFF = 8192      # grid-free single-block path below this
_DEFAULT_BATCH_TILE = 65536     # ~2 MiB of input per grid step


def _round_up(n, m):
    return ((n + m - 1) // m) * m


def _mlp_kernel(xT_ref, w1_ref, b1_ref, w2_ref, b2_ref, oT_ref):
    """Batch-on-lanes MLP forward.

    xT : [L, T]  input tile, feature-major (batch on the lane axis)
    w1 : [H, L]  fc1.weight (PyTorch layout)
    b1 : [H, 1]
    w2 : [O, H]  fc2.weight (PyTorch layout)
    b2 : [O, 1]
    oT : [O, T]  output tile (lane-dense stores)
    """
    # fc1: [H, L] @ [L, T] -> [H, T]
    h = jnp.dot(w1_ref[...], xT_ref[...],
                preferred_element_type=jnp.float32) + b1_ref[...]
    # sigmoid (exact): exp on EUP; IEEE handles saturation (1/(1+inf)=0).
    h = 1.0 / (1.0 + jnp.exp(-h))
    # fc2: [O, H] @ [H, T] -> [O, T]
    y = jnp.dot(w2_ref[...], h,
                preferred_element_type=jnp.float32) + b2_ref[...]
    oT_ref[...] = y.astype(oT_ref.dtype)


def net_forward(x, w1, b1, w2, b2, *, batch_tile=_DEFAULT_BATCH_TILE):
    """Pallas equivalent of Net.forward.

    x : [B, max_length] or [max_length] float32 (token ids cast to float)
    w1: [hidden_dim, max_length]   (PyTorch fc1.weight layout, [out, in])
    b1: [hidden_dim]
    w2: [output_dim, hidden_dim]   (PyTorch fc2.weight layout, [out, in])
    b2: [output_dim]
    returns [B, output_dim]
    """
    if x.ndim == 1:                           # torch: x = x.unsqueeze(0)
        x = x[None, :]
    x = x.astype(jnp.float32)
    B, L = x.shape
    H = w1.shape[0]
    O = w2.shape[0]

    w1 = w1.astype(jnp.float32)
    w2 = w2.astype(jnp.float32)
    b1c = b1.astype(jnp.float32).reshape(H, 1)
    b2c = b2.astype(jnp.float32).reshape(O, 1)

    if B <= _SMALL_BATCH_CUTOFF:
        # Small batch: single block, no grid, no pipelining machinery.
        xT = x.T                               # [L, B]
        yT = pl.pallas_call(
            _mlp_kernel,
            out_shape=jax.ShapeDtypeStruct((O, B), jnp.float32),
            in_specs=[pl.BlockSpec(memory_space=pltpu.MemorySpace.VMEM)] * 5,
            out_specs=pl.BlockSpec(memory_space=pltpu.MemorySpace.VMEM),
        )(xT, w1, b1c, w2, b2c)
        return yT.T                            # [B, O]

    # Large batch: grid over lane-aligned batch tiles; params resident
    # (constant index_map); batch axis "parallel" for v7x megacore.
    n_tiles = pl.cdiv(B, batch_tile)
    if n_tiles < 2:
        # Keep >= 2 tiles so the parallel axis can be sharded across 2 TCs.
        batch_tile = max(128, _round_up(pl.cdiv(B, 2), 128))
        n_tiles = pl.cdiv(B, batch_tile)
    Bp = n_tiles * batch_tile
    if Bp != B:
        x = jnp.pad(x, ((0, Bp - B), (0, 0)))
    xT = x.T                                   # [L, Bp], batch on lanes

    yT = pl.pallas_call(
        _mlp_kernel,
        out_shape=jax.ShapeDtypeStruct((O, Bp), jnp.float32),
        grid=(n_tiles,),
        in_specs=[
            pl.BlockSpec((L, batch_tile), lambda i: (0, i)),   # x tile
            pl.BlockSpec((H, L), lambda i: (0, 0)),            # w1 (resident)
            pl.BlockSpec((H, 1), lambda i: (0, 0)),            # b1
            pl.BlockSpec((O, H), lambda i: (0, 0)),            # w2
            pl.BlockSpec((O, 1), lambda i: (0, 0)),            # b2
        ],
        out_specs=pl.BlockSpec((O, batch_tile), lambda i: (0, i)),
        compiler_params=pltpu.CompilerParams(
            dimension_semantics=("parallel",)),
    )(xT, w1, b1c, w2, b2c)
    return yT[:, :B].T                         # [B, O]


def init_params(key):
    """Deterministic init mimicking PyTorch nn.Linear defaults
    (uniform +/- 1/sqrt(fan_in)); weights kept in PyTorch [out, in] layout."""
    k1, k2, k3, k4 = jax.random.split(key, 4)
    bound1 = 1.0 / (MAX_LENGTH ** 0.5)
    bound2 = 1.0 / (HIDDEN_DIM ** 0.5)
    w1 = jax.random.uniform(k1, (HIDDEN_DIM, MAX_LENGTH), jnp.float32,
                            -bound1, bound1)
    b1 = jax.random.uniform(k2, (HIDDEN_DIM,), jnp.float32, -bound1, bound1)
    w2 = jax.random.uniform(k3, (OUTPUT_DIM, HIDDEN_DIM), jnp.float32,
                            -bound2, bound2)
    b2 = jax.random.uniform(k4, (OUTPUT_DIM,), jnp.float32, -bound2, bound2)
    return w1, b1, w2, b2


def _reference(x, w1, b1, w2, b2):
    h = jax.nn.sigmoid(x @ w1.T + b1)
    return h @ w2.T + b2


if __name__ == "__main__":
    key = jax.random.PRNGKey(0)
    kp, kx1, kx2, kx3 = jax.random.split(key, 4)
    w1, b1, w2, b2 = init_params(kp)

    # 1) Small batch implied by the module (token-id sequences cast to float):
    #    exercises the grid-free single-block path.
    x_small = jax.random.randint(kx1, (BATCH, MAX_LENGTH), 0, 2).astype(jnp.float32)
    y_small = jax.block_until_ready(net_forward(x_small, w1, b1, w2, b2))
    assert y_small.shape == (BATCH, OUTPUT_DIM)
    assert jnp.allclose(y_small, _reference(x_small, w1, b1, w2, b2),
                        atol=1e-5), "small-batch mismatch vs reference"

    # 2) 1-D input (the torch unsqueeze(0) branch).
    x_1d = jax.random.randint(kx2, (MAX_LENGTH,), 0, 2).astype(jnp.float32)
    y_1d = jax.block_until_ready(net_forward(x_1d, w1, b1, w2, b2))
    assert y_1d.shape == (1, OUTPUT_DIM)
    assert jnp.allclose(y_1d, _reference(x_1d[None, :], w1, b1, w2, b2),
                        atol=1e-5), "1-D input mismatch vs reference"

    # 3) Larger batch: exercises the lane-dense, batch-tiled, megacore-parallel
    #    path (multiple tiles + padding to a tile multiple).
    B_big = 150000
    x_big = jax.random.randint(kx3, (B_big, MAX_LENGTH), 0, 2).astype(jnp.float32)
    y_big = jax.block_until_ready(net_forward(x_big, w1, b1, w2, b2))
    assert y_big.shape == (B_big, OUTPUT_DIM)
    assert jnp.allclose(y_big, _reference(x_big, w1, b1, w2, b2),
                        atol=1e-5), "batched mismatch vs reference"

    print("KERNEL_OK")
</pallas_src>

<mosaic_0001>
module attributes {stable_mosaic.version = 11 : i64} {
  func.func @_mlp_kernel(%arg0: memref<8x2xf32, #tpu.memory_space<vmem>>, %arg1: memref<6x8xf32, #tpu.memory_space<vmem>>, %arg2: memref<6x1xf32, #tpu.memory_space<vmem>>, %arg3: memref<2x6xf32, #tpu.memory_space<vmem>>, %arg4: memref<2x1xf32, #tpu.memory_space<vmem>>, %arg5: memref<2x2xf32, #tpu.memory_space<vmem>>) attributes {dimension_semantics = [], scalar_prefetch = 0 : i64, scratch_operands = 0 : i64, tpu.core_type = #tpu.core_type<tc>} {
    %c0 = arith.constant 0 : index
    %c0_0 = arith.constant 0 : index
    %0 = vector.load %arg1[%c0, %c0_0] : memref<6x8xf32, #tpu.memory_space<vmem>>, vector<6x8xf32>
    %c0_1 = arith.constant 0 : index
    %c0_2 = arith.constant 0 : index
    %1 = vector.load %arg0[%c0_1, %c0_2] : memref<8x2xf32, #tpu.memory_space<vmem>>, vector<8x2xf32>
    %cst = arith.constant dense<0.000000e+00> : vector<6x2xf32>
    %2 = tpu.matmul %0, %1, %cst {dimension_numbers = #tpu.dot_dimension_numbers<[1], [0], [0], [1], [0, 0, 1, 1], [], []>} : vector<6x8xf32>, vector<8x2xf32>, vector<6x2xf32> -> vector<6x2xf32>
    %c0_3 = arith.constant 0 : index
    %c0_4 = arith.constant 0 : index
    %3 = vector.load %arg2[%c0_3, %c0_4] : memref<6x1xf32, #tpu.memory_space<vmem>>, vector<6x1xf32>
    %4 = vector.broadcast %3 : vector<6x1xf32> to vector<6x2xf32>
    %5 = arith.addf %2, %4 : vector<6x2xf32>
    %cst_5 = arith.constant 0.000000e+00 : f32
    %6 = vector.broadcast %cst_5 : f32 to vector<6x2xf32>
    %7 = arith.subf %6, %5 : vector<6x2xf32>
    %8 = math.exp %7 : vector<6x2xf32>
    %cst_6 = arith.constant 1.000000e+00 : f32
    %9 = vector.broadcast %cst_6 : f32 to vector<6x2xf32>
    %10 = arith.addf %9, %8 : vector<6x2xf32>
    %cst_7 = arith.constant 1.000000e+00 : f32
    %11 = vector.broadcast %cst_7 : f32 to vector<6x2xf32>
    %12 = arith.divf %11, %10 : vector<6x2xf32>
    %c0_8 = arith.constant 0 : index
    %c0_9 = arith.constant 0 : index
    %13 = vector.load %arg3[%c0_8, %c0_9] : memref<2x6xf32, #tpu.memory_space<vmem>>, vector<2x6xf32>
    %cst_10 = arith.constant dense<0.000000e+00> : vector<2x2xf32>
    %14 = tpu.matmul %13, %12, %cst_10 {dimension_numbers = #tpu.dot_dimension_numbers<[1], [0], [0], [1], [0, 0, 1, 1], [], []>} : vector<2x6xf32>, vector<6x2xf32>, vector<2x2xf32> -> vector<2x2xf32>
    %c0_11 = arith.constant 0 : index
    %c0_12 = arith.constant 0 : index
    %15 = vector.load %arg4[%c0_11, %c0_12] : memref<2x1xf32, #tpu.memory_space<vmem>>, vector<2x1xf32>
    %16 = vector.broadcast %15 : vector<2x1xf32> to vector<2x2xf32>
    %17 = arith.addf %14, %16 : vector<2x2xf32>
    %c0_13 = arith.constant 0 : index
    %c0_14 = arith.constant 0 : index
    %18 = vector.load %arg5[%c0_13, %c0_14] : memref<2x2xf32, #tpu.memory_space<vmem>>, vector<2x2xf32>
    tpu.vector_store %arg5[%c0_13, %c0_14], %17 {strides = array<i32>} : memref<2x2xf32, #tpu.memory_space<vmem>>, vector<2x2xf32>,
    return
  }
}

</mosaic_0001>

<bundles_post_ra>
// kernel: tpu_custom_call.1
= control target key start
LH: loop header
LB: loop body
LE: loop exit
PB: predicated region body
PF: predicated region fallthrough
CT: control target
= control target key end

     0   :  { %vm29_vm0 = vcmask 64512   ;;  %v161_v2 = vmov 0   ;;  %s211_s0 = inlined_call_operand.vmem [shape: f32[8,2], index: 0, kind: input, shape index: {}]   ;;  %s212_s1 = inlined_call_operand.vmem [shape: f32[6,8], index: 1, kind: input, shape index: {}]   ;;  %s213_s2 = inlined_call_operand.vmem [shape: f32[6,1], index: 2, kind: input, shape index: {}]   ;;  %s214_s3 = inlined_call_operand.vmem [shape: f32[2,6], index: 3, kind: input, shape index: {}]   ;;  %s215_s4 = inlined_call_operand.vmem [shape: f32[2,1], index: 4, kind: input, shape index: {}]   ;;  %s216_s5 = inlined_call_operand.hbm [shape: f32[2,2], index: 5, kind: output, shape index: {}]  }
   0x1   :  { %v22_v0 = vld [vmem:[%s211_s0] sm:$0xff]  ;;  %130 = vset.pattern.permute.xlu0 %v161_v2 }
   0x2   :  { %v21_v1 = vld [vmem:[%s212_s1] sm:$0x3f]  ;;  %48 = vmatpush.msra.mxu0 %v22_v0 }
   0x3   :  { %v23_v3 = vld [vmem:[%s213_s2] sm:$0x3f] }
   0x4   :  { %10 = vsyncpa [#allocation3], 0  ;;  %125 = vmatmul.msk.f32.vlgmr.msra.gmra.mxu0 %vm29_vm0, %v21_v1  ;;  %26 = vperm.xlu0 %130, %v23_v3   ;;  %v73_v4 = vld [vmem:[%s215_s4] sm:$0x3]  ;;  %vm83_vm4 = vcmask 1045504   ;;  %vm79_vm6 = vcmask 48128  }
   0x5   :  { %v72_v21 = vld [vmem:[%s214_s3] sm:$0x3]  ;;  %s162_s2 = smov [#allocation2]   ;;  %s116_s28 = sshll.u32 %s216_s5, 4  ;;  %vm107_vm7 = vcmask 9216   ;;  %s117_s28 = int_to_ptr.hbm [resolvable:$true] %s116_s28 }
   0x6   :  { %s114_s4 = sshll.u32 %s162_s2, 4  ;;  %s115_s4 = int_to_ptr.vmem [resolvable:$true] %s114_s4 }
   0xc   :  { %76 = vperm.xlu0 %130, %v73_v4  }
  0x76   :  { %v27_v5 = vpop.permute.xlu0 %26 }
  0x7e   :  { %v77_v23 = vpop.permute.xlu0 %76 }
  0x81   :  { %v50_v6 = vpop.f32.mrf.mxu0 }
  0x82   :  { %v51_v7 = vadd.f32 %v50_v6, %v27_v5 }
  0x84   :  { %v53_v8 = vsub.f32 0.0, %v51_v7 }
  0x86   :  { %v54_v9 = vmul.f32 1.442695, %v53_v8 }
  0x88   :  { %131 = vpow2.f32 %v54_v9 }
  0x8e   :  { %v132_v10 = vpop.eup %131 }
  0x8f   :  { %v56_v11 = vadd.f32 1.0, %v132_v10 }
  0x91   :  { %133 = vrcp.f32 %v56_v11  ;;  %v68_v15 = vand.u32 2147483648, %v56_v11  ;;  %v66_v17 = vand.u32 2147483647, %v56_v11  ;;  %vm62_vm2 = vweird.f32 %v56_v11 }
  0x93   :  { %v69_v19 = vor.u32 1.1754944e-38, %v68_v15  ;;  %vm67_vm5 = vcmp.eq.f32.partialorder %v66_v17, 8.507059e+37 }
  0x97   :  { %v134_v12 = vpop.eup %133 }
  0x98   :  { %v58_v13 = vmul.f32 %v134_v12, %v56_v11  ;;  %vm63_vm1 = vweird.f32 %v134_v12 }
  0x99   :  { %vm64_vm3 = vmor %vm62_vm2, %vm63_vm1 }
  0x9a   :  { %v59_v14 = vsub.f32 1.0, %v58_v13 }
  0x9c   :  { %v60_v16 = vmul.f32 %v134_v12, %v59_v14 }
  0x9e   :  { %v61_v18 = vadd.f32 %v134_v12, %v60_v16 }
  0xa0   :  { %v65_v20 = vsel %vm64_vm3, %v134_v12, %v61_v18 }
  0xa1   :  { %v70_v22 = vsel %vm67_vm5, %v69_v19, %v65_v20 }
  0xa2   :  { %126 = vmatpush.msk.msra.mxu1 %vm83_vm4, %v70_v22 }
  0xa3   :  { %127 = vmatmul.msk.f32.vlgmr.msra.gmra.mxu1 %vm79_vm6, %v72_v21 }
 0x120   :  { %v104_v24 = vpop.f32.mrf.mxu1 }
 0x121   :  { %v105_v25 = vadd.f32 %v104_v24, %v77_v23 }
 0x123   :  { %108 = vst.msk [vmem:[#allocation2] sm:$0x3] %vm107_vm7, %v105_v25 }
 0x124   :  { %119 = dma.vmem_to_hbm [thread:$0]  %s115_s4, 32, %s117_s28, [#allocation3]  }
 0x125   :  { %159 = dma.done.wait [#allocation3], 32  }
 0x126   :  { %160 = vsyncadd [#allocation3], 4294967264 }
 0x127   :  { %124 = vsyncpa [#allocation3], 1 }

</bundles_post_ra>
